<compile_context>
chip_gen: v7x
topology: tpu7x:2x2x1
jax: 0.10.0
libtpu: 0.0.40
codegen_flags: <defaults>
</compile_context>

<pallas_src>
import functools

import jax
import jax.numpy as jnp
import numpy as np
from jax import lax
from jax.experimental import pallas as pl
from jax.experimental.pallas import tpu as pltpu


def _round_up(x, m):
    return (x + m - 1) // m * m


# ---------------- one-time capability probes (run in __init__, tiny kernels) ----------------

def _probe_roll_is_forward():
    """Detect pltpu.roll's lane-shift direction so the host-side packed-weight
    row layout always matches the in-kernel lane packing.
    Returns True if a positive shift moves lane i -> lane i+shift (jnp.roll)."""
    def k(x_ref, o_ref):
        o_ref[...] = pltpu.roll(x_ref[...], shift=1, axis=1)

    x = jnp.zeros((8, 128), jnp.float32).at[:, 0].set(1.0)
    y = pl.pallas_call(k, out_shape=jax.ShapeDtypeStruct((8, 128), jnp.float32))(x)
    return bool(np.asarray(y)[0, 1] == 1.0)


def _probe_bf16_activation_path(roll_forward):
    """True if Mosaic supports the bf16 ops the fast (bf16-scratch) path needs:
    odd-row-offset slices of a bf16 ref, i32-mask select on bf16, bf16 lane roll.
    On failure (exception or wrong numerics) we fall back to f32 scratch."""
    def k(x_ref, o_ref):
        s = x_ref[1:17, :]                                    # unaligned packed-row slice
        m = lax.broadcasted_iota(jnp.int32, (16, 128), 1) != 0
        s = jnp.where(m, s, jnp.zeros_like(s))                # mask-select on bf16
        o_ref[...] = pltpu.roll(s, shift=8, axis=1) + x_ref[16:32, :]

    try:
        xb = ((jnp.arange(32 * 128, dtype=jnp.float32) % 251.0)
              .reshape(32, 128).astype(jnp.bfloat16))
        y = pl.pallas_call(
            k, out_shape=jax.ShapeDtypeStruct((16, 128), jnp.bfloat16))(xb)
        m = lax.broadcasted_iota(jnp.int32, (16, 128), 1) != 0
        s = jnp.where(m, xb[1:17, :], jnp.zeros_like(xb[1:17, :]))
        ref = jnp.roll(s, 8 if roll_forward else -8, axis=1) + xb[16:32, :]
        return bool(np.allclose(np.asarray(y, dtype=np.float32),
                                np.asarray(ref, dtype=np.float32),
                                rtol=1e-2, atol=1e-2))
    except Exception:
        return False


# ---------------- fused Pallas kernel (whole forward, one image / grid step) ----------------

def _embeddingnet_fused_kernel(x_ref, w_stem_ref, w_b1_ref, w_b2_ref, bias_ref,
                               o_ref, fpad_ref, h_ref,
                               *, H, W, CP, CSTRIDE, P, ACT_DTYPE):
    """Whole EmbeddingNet forward for one image.

    x_ref     : (1, H*W, CP) bf16   input tokens, channels zero-padded to CP
    w_*_ref   : (CP, CP) bf16       tap-packed conv weights, BN scale folded in
    bias_ref  : (3, CP) f32         folded-BN bias per conv
    o_ref     : (1, CP) f32         pooled embedding (lane-dense)
    fpad_ref  : (P + H*W + P, CP)   ACT_DTYPE scratch: token map with zero halo
    h_ref     : (H*W, CP)           ACT_DTYPE scratch: residual (identity) branch
    """
    HW = H * W

    # Border masks: a +-1 token shift wraps across an image-row boundary at the
    # left/right edge of the picture.  Built once, reused by all three convs.
    col = lax.broadcasted_iota(jnp.int32, (H, W, CP), 1).reshape(HW, CP)
    not_left = col != 0
    not_right = col != (W - 1)

    def packed_conv(w_ref, idx, residual_ref=None):
        """3x3 SAME conv of the tokens in fpad_ref as ONE MXU dot:
        the 9 shifted slabs are lane-rolled into disjoint CSTRIDE-wide windows
        of the K dimension and merged, then multiplied by the tap-packed
        (BN-scale-folded) weight.  Epilogue: + bias (+ identity) + ReLU."""
        packed = None
        for kh in range(3):
            for kw in range(3):
                t = kh * 3 + kw
                shift = (kh - 1) * W + (kw - 1)
                slab = fpad_ref[P + shift:P + shift + HW, :]        # (HW, CP)
                if kw == 0:                       # would wrap to previous row
                    slab = jnp.where(not_left, slab, jnp.zeros_like(slab))
                elif kw == 2:                     # would wrap to next row
                    slab = jnp.where(not_right, slab, jnp.zeros_like(slab))
                if t:                             # lane windows [t*CSTRIDE, +CSTRIDE)
                    slab = pltpu.roll(slab, shift=t * CSTRIDE, axis=1)
                packed = slab if packed is None else packed + slab
        if packed.dtype != jnp.bfloat16:          # f32-scratch fallback: one cast/conv
            packed = packed.astype(jnp.bfloat16)
        acc = jnp.dot(packed, w_ref[...], preferred_element_type=jnp.float32)
        y = acc + bias_ref[idx:idx + 1, :]
        if residual_ref is not None:
            y = y + residual_ref[...].astype(jnp.float32)
        return jnp.maximum(y, 0.0)

    # Re-zero only the two halo strips; the interior is fully overwritten below
    # (keep that invariant if the layout ever changes).
    fpad_ref[0:P, :] = jnp.zeros((P, CP), ACT_DTYPE)
    fpad_ref[P + HW:P + HW + P, :] = jnp.zeros((P, CP), ACT_DTYPE)

    fpad_ref[P:P + HW, :] = x_ref[0].astype(ACT_DTYPE)       # input tokens
    h = packed_conv(w_stem_ref, 0)                           # stem conv+BN+ReLU
    h_act = h.astype(ACT_DTYPE)
    h_ref[...] = h_act                                       # identity branch
    fpad_ref[P:P + HW, :] = h_act
    y = packed_conv(w_b1_ref, 1)                             # block conv1+BN+ReLU
    fpad_ref[P:P + HW, :] = y.astype(ACT_DTYPE)
    y = packed_conv(w_b2_ref, 2, residual_ref=h_ref)         # conv2+BN+id+ReLU

    # fused AdaptiveAvgPool2d((1,1)) -> (1, CP); .squeeze() happens in wrapper
    o_ref[...] = jnp.mean(y, axis=0, keepdims=True)


# ---------------- host-side one-time parameter packing ----------------

def _prepare_packed_params(params, *, cp, cstride, roll_forward):
    """Fold BN scale into the conv weights, pack the 9 taps along K (rows
    tap*cstride + cin of a (cp, cp) matrix, matching the in-kernel lane
    packing), cast to bf16, and pad the BN bias to cp lanes."""
    def pack_w(w, scale):
        cin, cout = int(w.shape[2]), int(w.shape[3])
        wf = w.astype(jnp.float32) * scale.astype(jnp.float32)[None, None, None, :]
        packed = jnp.zeros((cp, cp), jnp.float32)
        for t in range(9):
            r = (t * cstride) % cp if roll_forward else (-t * cstride) % cp
            packed = packed.at[r:r + cin, :cout].set(wf[t // 3, t % 3])
        return packed.astype(jnp.bfloat16)

    def pad_b(b):
        return jnp.pad(b.astype(jnp.float32), (0, cp - b.shape[0]))

    w_stem = pack_w(params["w_stem"], params["bn_stem"][0])
    w_b1 = pack_w(params["w_b1"], params["bn_b1"][0])
    w_b2 = pack_w(params["w_b2"], params["bn_b2"][0])
    biases = jnp.stack([pad_b(params["bn_stem"][1]),
                        pad_b(params["bn_b1"][1]),
                        pad_b(params["bn_b2"][1])])
    return w_stem, w_b1, w_b2, biases


# ---------------- wrapper ----------------

def embeddingnet_forward_pallas(x_nchw, w_stem_p, w_b1_p, w_b2_p, biases,
                                *, c_out, cp, cstride, act_dtype):
    """PyTorch-layout NCHW input -> torch-style squeezed embedding."""
    N, c_in, H, W = x_nchw.shape
    HW = H * W
    P = _round_up(W + 1, 16)     # halo rows; 16-row multiple keeps bf16 stores tile-aligned

    # NHWC tokens, zero-padded to cp lanes, shipped as bf16 (halves input DMA).
    # TODO(synk): at large H*W, ship (N, HW, c_in) narrow tokens and widen to cp
    # lanes in-kernel to cut input HBM traffic a further ~16x.
    x = jnp.transpose(x_nchw, (0, 2, 3, 1)).astype(jnp.float32)
    x_tok = jnp.pad(x, ((0, 0), (0, 0), (0, 0), (0, cp - c_in)))
    x_tok = x_tok.reshape(N, HW, cp).astype(jnp.bfloat16)

    kernel = functools.partial(_embeddingnet_fused_kernel, H=H, W=W, CP=cp,
                               CSTRIDE=cstride, P=P, ACT_DTYPE=act_dtype)

    # VMEM budget from the actual block + scratch footprint (well inside v7x's 64 MiB).
    act_bytes = jnp.dtype(act_dtype).itemsize
    scratch_bytes = (2 * P + HW) * cp * act_bytes + HW * cp * act_bytes
    io_bytes = 2 * (HW * cp * 2 + 3 * cp * cp * 2 + 3 * cp * 4 + cp * 4)   # double-buffered
    vmem_limit = int(min(max(2 * (scratch_bytes + io_bytes), 4 << 20), 64 << 20))

    out = pl.pallas_call(
        kernel,
        out_shape=jax.ShapeDtypeStruct((N, cp), jnp.float32),
        grid=(N,),
        in_specs=[
            pl.BlockSpec((1, HW, cp), lambda n: (n, 0, 0)),
            # Grid-invariant weights are DMA'd once; pl.Buffered(1) could trim
            # their double-buffer VMEM on v7x once channels/taps scale up.
            pl.BlockSpec((cp, cp), lambda n: (0, 0)),
            pl.BlockSpec((cp, cp), lambda n: (0, 0)),
            pl.BlockSpec((cp, cp), lambda n: (0, 0)),
            pl.BlockSpec((3, cp), lambda n: (0, 0)),
        ],
        out_specs=pl.BlockSpec((1, cp), lambda n: (n, 0)),
        scratch_shapes=[
            pltpu.VMEM((P + HW + P, cp), act_dtype),   # zero-haloed token map
            pltpu.VMEM((HW, cp), act_dtype),           # residual (identity) branch
        ],
        compiler_params=pltpu.CompilerParams(
            # one image per TensorCore on v7x; a cheap sequential loop on v5e/v6e.
            # TODO(synk): on v5e/v6e, batching >=2 images per grid step (M = imgs*HW)
            # would amortize the ~0.35us per-step overhead.
            dimension_semantics=("parallel",),
            vmem_limit_bytes=vmem_limit,
        ),
    )(x_tok, w_stem_p, w_b1_p, w_b2_p, biases)

    # drop the padded channels, then torch-style .squeeze()
    # (note: like torch, this also drops the batch dim when N == 1)
    return jnp.squeeze(out[:, :c_out])


class EmbeddingNetPallas:
    """ResNet-style backbone with the final FC removed:
    stem conv+BN+ReLU -> one basic residual block -> global avg pool -> squeeze."""

    def __init__(self, params, cp=128, cstride=8):
        c_in = int(params["w_stem"].shape[2])
        c = int(params["w_stem"].shape[3])
        if max(c_in, c) > cstride or 9 * cstride > cp:
            raise ValueError("tap-packed kernel requires conv channels <= cstride "
                             "and 9*cstride <= cp")
        roll_forward = _probe_roll_is_forward()
        act_dtype = (jnp.bfloat16 if _probe_bf16_activation_path(roll_forward)
                     else jnp.float32)
        # One-time weight prep (pad, tap-pack, BN-scale fold, bf16 cast) hoisted
        # out of the jitted forward.
        self._packed = _prepare_packed_params(params, cp=cp, cstride=cstride,
                                              roll_forward=roll_forward)
        self._fwd = jax.jit(functools.partial(
            embeddingnet_forward_pallas,
            c_out=c, cp=cp, cstride=cstride, act_dtype=act_dtype))

    def __call__(self, x_nchw):
        return self._fwd(x_nchw, *self._packed)

    def get_embedding(self, x):
        return self(x)


# ---------------- parameters (deterministic, synthetic) ----------------

def _fold_bn(gamma, beta, mean, var, eps=1e-5):
    scale = gamma / jnp.sqrt(var + eps)
    bias = beta - mean * scale
    return scale, bias


def init_params(key, c_in=4, c=8):
    ks = jax.random.split(key, 6)

    def conv_w(k, cin, cout):
        return jax.random.normal(k, (3, 3, cin, cout), jnp.float32) / np.sqrt(9 * cin)

    def bn(k, cout):
        k1, k2, k3, k4 = jax.random.split(k, 4)
        gamma = 1.0 + 0.1 * jax.random.normal(k1, (cout,), jnp.float32)
        beta = 0.1 * jax.random.normal(k2, (cout,), jnp.float32)
        mean = 0.05 * jax.random.normal(k3, (cout,), jnp.float32)
        var = 1.0 + 0.1 * jax.random.uniform(k4, (cout,), jnp.float32)
        return _fold_bn(gamma, beta, mean, var)

    return {
        "w_stem": conv_w(ks[0], c_in, c), "bn_stem": bn(ks[1], c),
        "w_b1": conv_w(ks[2], c, c), "bn_b1": bn(ks[3], c),
        "w_b2": conv_w(ks[4], c, c), "bn_b2": bn(ks[5], c),
    }


# ---------------- pure-JAX (f32) reference for verification ----------------

def reference_forward(x_nchw, params):
    p = params
    x = jnp.transpose(x_nchw, (0, 2, 3, 1)).astype(jnp.float32)

    def conv_bn(x, w, sb, residual=None, relu=True):
        s, b = sb
        y = lax.conv_general_dilated(x, w, (1, 1), "SAME",
                                     dimension_numbers=("NHWC", "HWIO", "NHWC"))
        y = y * s + b
        if residual is not None:
            y = y + residual
        return jnp.maximum(y, 0.0) if relu else y

    h = conv_bn(x, p["w_stem"], p["bn_stem"])
    y = conv_bn(h, p["w_b1"], p["bn_b1"])
    h = conv_bn(y, p["w_b2"], p["bn_b2"], residual=h)
    return jnp.squeeze(jnp.mean(h, axis=(1, 2)))


if __name__ == "__main__":
    key = jax.random.PRNGKey(0)
    kx, kp = jax.random.split(key)

    N, C_in, H, W = 2, 4, 16, 16                    # PyTorch-style NCHW input
    x = jax.random.normal(kx, (N, C_in, H, W), jnp.float32)
    params = init_params(kp, c_in=C_in, c=8)

    net = EmbeddingNetPallas(params)
    out = jax.block_until_ready(net(x))             # (N, 8) embedding

    ref = jax.block_until_ready(reference_forward(x, params))
    # Kernel uses bf16 matmul operands / bf16 activation storage with f32
    # accumulation and f32 epilogues; reference is pure f32.
    np.testing.assert_allclose(np.asarray(out), np.asarray(ref),
                               atol=2e-2, rtol=2e-2)

    print("KERNEL_OK")
</pallas_src>

<mosaic_0001>
module attributes {stable_mosaic.version = 11 : i64} {
  func.func @k(%arg0: memref<8x128xf32, #tpu.memory_space<vmem>>, %arg1: memref<8x128xf32, #tpu.memory_space<vmem>>) attributes {dimension_semantics = [], scalar_prefetch = 0 : i64, scratch_operands = 0 : i64, tpu.core_type = #tpu.core_type<tc>} {
    %c0 = arith.constant 0 : index
    %c0_0 = arith.constant 0 : index
    %0 = vector.load %arg0[%c0, %c0_0] : memref<8x128xf32, #tpu.memory_space<vmem>>, vector<8x128xf32>
    %c1_i32 = arith.constant 1 : i32
    %1 = tpu.dynamic_rotate %0 by %c1_i32 dim 1 : vector<8x128xf32>, i32 -> vector<8x128xf32>
    %c0_1 = arith.constant 0 : index
    %c0_2 = arith.constant 0 : index
    %2 = vector.load %arg1[%c0_1, %c0_2] : memref<8x128xf32, #tpu.memory_space<vmem>>, vector<8x128xf32>
    tpu.vector_store %arg1[%c0_1, %c0_2], %1 {strides = array<i32>} : memref<8x128xf32, #tpu.memory_space<vmem>>, vector<8x128xf32>,
    return
  }
}

</mosaic_0001>

<bundles_post_ra>
// kernel: tpu_custom_call.1
= control target key start
LH: loop header
LB: loop body
LE: loop exit
PB: predicated region body
PF: predicated region fallthrough
CT: control target
= control target key end

     0   :  { %6 = vsyncpa [#allocation3], 0  ;;  %s128_s0 = inlined_call_operand.hbm [shape: f32[8,128], index: 0, kind: input, shape index: {}]   ;;  %s129_s1 = inlined_call_operand.hbm [shape: f32[8,128], index: 1, kind: output, shape index: {}]  }
   0x1   :  { %7 = vsyncpa [#allocation4], 0  ;;  %s91_s6 = smov [#allocation2]   ;;  %s43_s10 = scalar_lea.hbm %s128_s0, 128 }
   0x2   :  { %s14_s7 = sshll.u32 %s91_s6, 4  ;;  %p44_p0 = scmp.ne.s32.totalorder %s128_s0, %s43_s10  ;;  %s15_s7 = int_to_ptr.vmem [resolvable:$true] %s14_s7 }
   0x3   :  { %p47_p1 = scmp.lt.u32.totalorder %s43_s10, %s128_s0 }
   0x5   :  { %p49_p2 = pnand %p47_p1, %p44_p0 }
   0x7   :  { %52 = shalt.err (!%p49_p2)
}
   0x8   :  { %s53_s15 = scalar_lea.vmem %s15_s7, 128  ;;  %p58_p4 = scmp.lt.s32.totalorder %s15_s7, %s15_s7 }
   0x9   :  { %p54_p3 = scmp.ne.s32.totalorder %s15_s7, %s53_s15  ;;  %p59_p5 = scmp.lt.s32.totalorder %s53_s15, %s53_s15 }
   0xb   :  { %p60_p6 = por %p59_p5, %p58_p4 }
   0xd   :  { %p61_p7 = pnand %p60_p6, %p54_p3 }
   0xf   :  { %64 = shalt.err (!%p61_p7)
}
  0x10   :  { %17 = dma.hbm_to_vmem [thread:$0]  %s128_s0, 128, %s15_s7, [#allocation3]  }
  0x11   :  { %87 = dma.done.wait [#allocation3], 128  }
  0x12   :  { %88 = vsyncadd [#allocation3], 4294967168  ;;  %v21_v0 = vld [vmem:[#allocation2] sm:$0xff]  ;;  %s92_s18 = smov 1   ;;  %s93_s19 = smov [#allocation5]  }
  0x13   :  { %22 = vrot.lane.b32.xlu0 %v21_v0, %s92_s18  ;;  %s31_s20 = sshll.u32 %s93_s19, 4  ;;  %s32_s20 = int_to_ptr.vmem [resolvable:$true] %s31_s20 }
  0x14   :  { %s65_s21 = scalar_lea.vmem %s32_s20, 128  ;;  %p70_p9 = scmp.lt.s32.totalorder %s32_s20, %s32_s20 }
  0x15   :  { %p66_p8 = scmp.ne.s32.totalorder %s32_s20, %s65_s21  ;;  %p71_p10 = scmp.lt.s32.totalorder %s65_s21, %s65_s21 }
  0x17   :  { %p72_p11 = por %p71_p10, %p70_p9 }
  0x19   :  { %p73_p12 = pnand %p72_p11, %p66_p8 }
  0x85   :  { %v23_v1 = vpop.permute.xlu0 %22 }
  0x86   :  { %24 = vst [vmem:[#allocation5] sm:$0xff] %v23_v1 }
  0x87   :  { %76 = shalt.err (!%p73_p12)
}
  0x88   :  { %s77_s0 = scalar_lea.hbm %s129_s1, 128 }
  0x89   :  { %p78_p13 = scmp.ne.s32.totalorder %s129_s1, %s77_s0  ;;  %p81_p0 = scmp.lt.u32.totalorder %s77_s0, %s129_s1 }
  0x8b   :  { %p83_p1 = pnand %p81_p0, %p78_p13 }
  0x8d   :  { %86 = shalt.err (!%p83_p1)
}
  0x8e   :  { %34 = dma.vmem_to_hbm [thread:$0]  %s32_s20, 128, %s129_s1, [#allocation4]  }
  0x8f   :  { %89 = dma.done.wait [#allocation4], 128  }
  0x90   :  { %90 = vsyncadd [#allocation4], 4294967168 }
  0x91   :  { %38 = vsyncpa [#allocation3], 1 }
  0x92   :  { %39 = vsyncpa [#allocation4], 1 }

</bundles_post_ra>
